<compile_context>
chip_gen: v7x
topology: tpu7x:2x2x1
jax: 0.10.0
libtpu: 0.0.40
codegen_flags: <defaults>
</compile_context>

<pallas_src>
import jax
import jax.numpy as jnp
from jax.experimental import pallas as pl
from jax.experimental.pallas import tpu as pltpu

_LANES = 128
_SUBLANES = 8


def _round_up(x, m):
    return ((x + m - 1) // m) * m


def _sobel_rows(x0, x1, x2):
    """Sobel magnitude for a band of output rows.

    x0 / x1 / x2: (rows, Wp) f32 holding input rows r, r+1, r+2 for every output row r.
    Column c of the result uses input columns c, c+1, c+2; only columns [0, W-2) are valid.
    The last two logical columns (and any lane padding) contain circular-roll wraparound /
    padding garbage BY DESIGN and must be dropped by the masked output writeback.
    """
    wp = x0.shape[-1]
    p = x0 + 2.0 * x1 + x2                            # vertical [1, 2, 1]
    q = x0 - x2                                       # vertical [1, 0, -1]
    # Horizontal taps via circular lane rolls (XLU slot, co-issues with the VALU work):
    # rolling by wp - k places column c+k at lane c (jnp.roll convention).
    p2 = pltpu.roll(p, shift=wp - 2, axis=1)          # p[:, c+2]
    q1 = pltpu.roll(q, shift=wp - 1, axis=1)          # q[:, c+1]
    q2 = pltpu.roll(q, shift=wp - 2, axis=1)          # q[:, c+2]
    gx = p - p2                                       # horizontal [1, 0, -1] on p
    gy = q + 2.0 * q1 + q2                            # horizontal [1, 2, 1] on q
    # PyTorch's Gx/Gy carry a common factor 2; fold it outside the sqrt.
    return 2.0 * jnp.sqrt(gx * gx + gy * gy)


def _sobel_kernel(m_ref, h_ref, o_ref):
    # m_ref: (TILE_H, Wp)   input rows [r*TILE_H, r*TILE_H + TILE_H)
    # h_ref: (8, Wp)        input rows [(r+1)*TILE_H, +8) (clamped) -> 2-row bottom halo
    # o_ref: (TILE_H, Wop)  output rows [r*TILE_H, r*TILE_H + TILE_H)
    tile_h, wop = o_ref.shape
    tb = tile_h - 2                                   # output rows computable from m_ref alone

    # Bulk rows: all three vertical taps are plain shifted-address Ref loads (no value-level
    # sublane slicing of plane-sized temporaries).
    x0 = m_ref[0:tb, :].astype(jnp.float32)
    x1 = m_ref[1:tb + 1, :].astype(jnp.float32)
    x2 = m_ref[2:tile_h, :].astype(jnp.float32)
    o_ref[0:tb, :] = _sobel_rows(x0, x1, x2)[:, :wop].astype(o_ref.dtype)

    # Seam rows: the last two output rows of the tile also need the first two halo rows.
    # When those rows fall outside the image the output rows are out of range too and the
    # masked writeback drops them, so garbage there is harmless.
    r0 = m_ref[tb:tb + 1, :].astype(jnp.float32)
    r1 = m_ref[tb + 1:tile_h, :].astype(jnp.float32)
    h0 = h_ref[0:1, :].astype(jnp.float32)
    h1 = h_ref[1:2, :].astype(jnp.float32)
    o_ref[tb:tb + 1, :] = _sobel_rows(r0, r1, h0)[:, :wop].astype(o_ref.dtype)
    o_ref[tb + 1:tile_h, :] = _sobel_rows(r1, h0, h1)[:, :wop].astype(o_ref.dtype)


def _pick_tile_h(ho, wp):
    # Keep ~10 live f32 planes of (tile_h, Wp) (double-buffered in/out blocks + elementwise
    # temporaries) around 24 MiB so 2-deep pipelining never presses the scoped-VMEM limit on
    # any generation (v7x has only 64 MiB physical VMEM).  Large tiles keep the ~0.35 us/step
    # grid overhead well amortized.
    rows = (24 * 1024 * 1024) // (10 * 4 * wp)
    rows = (rows // _SUBLANES) * _SUBLANES
    rows = max(_SUBLANES, min(512, rows))
    return min(rows, _round_up(ho, _SUBLANES))


def sobel(img, *, tile_h=None, out_dtype=None):
    """img: (N, 1, H, W) -> (N, 1, H-2, W-2); same math as the PyTorch Sobel module."""
    N, C, H, W = img.shape
    assert C == 1, "Sobel module is Conv2d(in_channels=1, ...)"
    assert H >= 3 and W >= 3
    Ho, Wo = H - 2, W - 2
    out_dtype = jnp.result_type(img.dtype if out_dtype is None else out_dtype)

    # Lane-aligned BLOCK widths.  The HBM arrays themselves stay unpadded; Pallas masks the
    # partial edge DMAs, so there is no wrapper-side jnp.pad pass over input or output.
    wp = _round_up(W, _LANES)
    wop = _round_up(Wo, _LANES)

    if tile_h is None:
        tile_h = _pick_tile_h(Ho, wp)
    else:
        tile_h = max(_SUBLANES, (int(tile_h) // _SUBLANES) * _SUBLANES)
    nt = (Ho + tile_h - 1) // tile_h
    hb_last = (H - 1) // _SUBLANES                    # last halo block still overlapping the image

    def main_map(n, r):                               # main input block and output block
        return (n, 0, r, 0)

    def halo_map(n, r):
        # First 8 rows of the next row tile.  Clamped so the block always overlaps the image;
        # whenever the clamp engages, the seam rows it would feed are masked out anyway.
        return (n, 0, jnp.minimum((r + 1) * (tile_h // _SUBLANES), hb_last), 0)

    in_bytes = img.dtype.itemsize
    out_bytes = out_dtype.itemsize
    # Scoped-VMEM request from the actual working set (double-buffered blocks + ~8 temporaries),
    # 25% headroom, capped at 48 MiB so we never claim v7x's entire 64 MiB physical VMEM.
    working = (2 * (tile_h + _SUBLANES) * wp * in_bytes
               + 2 * tile_h * wop * out_bytes
               + 8 * tile_h * wp * 4)
    vmem_limit = int(min(48 * 1024 * 1024, max(32 * 1024 * 1024, 1.25 * working)))

    cost = pl.CostEstimate(
        flops=12 * N * Ho * Wo,
        transcendentals=N * Ho * Wo,
        bytes_accessed=N * (H + nt * _SUBLANES) * W * in_bytes + N * Ho * Wo * out_bytes,
    )

    return pl.pallas_call(
        _sobel_kernel,
        out_shape=jax.ShapeDtypeStruct((N, 1, Ho, Wo), out_dtype),
        grid_spec=pltpu.PrefetchScalarGridSpec(
            num_scalar_prefetch=0,
            grid=(N, nt),                             # (image, row tile); both parallel
            in_specs=[
                pl.BlockSpec((None, None, tile_h, wp), main_map),
                pl.BlockSpec((None, None, _SUBLANES, wp), halo_map),
            ],
            out_specs=pl.BlockSpec((None, None, tile_h, wop), main_map),
        ),
        compiler_params=pltpu.CompilerParams(
            dimension_semantics=("parallel", "parallel"),
            vmem_limit_bytes=vmem_limit,
        ),
        cost_estimate=cost,
    )(img, img)                                       # same array: main blocks + halo blocks


def _reference(img):
    # Pure-JAX reference: direct 3x3 valid conv with the PyTorch Sobel weights.
    Gx = jnp.array([[2.0, 0.0, -2.0], [4.0, 0.0, -4.0], [2.0, 0.0, -2.0]], jnp.float32)
    Gy = jnp.array([[2.0, 4.0, 2.0], [0.0, 0.0, 0.0], [-2.0, -4.0, -2.0]], jnp.float32)
    x = img[:, 0].astype(jnp.float32)                 # (N, H, W)
    N, H, W = x.shape
    Ho, Wo = H - 2, W - 2
    gx = jnp.zeros((N, Ho, Wo), jnp.float32)
    gy = jnp.zeros((N, Ho, Wo), jnp.float32)
    for di in range(3):
        for dj in range(3):
            patch = x[:, di:di + Ho, dj:dj + Wo]
            gx = gx + Gx[di, dj] * patch
            gy = gy + Gy[di, dj] * patch
    return jnp.sqrt(gx * gx + gy * gy)[:, None]       # (N, 1, Ho, Wo)


if __name__ == "__main__":
    key = jax.random.PRNGKey(0)
    cases = [
        ((2, 1, 16, 16), None),     # tiny plane, single row tile, lane-masked edge DMAs
        ((2, 1, 24, 256), None),    # width already a multiple of 128
        ((1, 1, 130, 136), 64),     # two exact row tiles: halo rows feed the last tile's seam
        ((1, 1, 150, 200), 64),     # three row tiles with a partial last tile (Ho = 148)
    ]
    for shape, th in cases:
        key, sub = jax.random.split(key)
        img = jax.random.normal(sub, shape, dtype=jnp.float32)
        out = jax.block_until_ready(sobel(img, tile_h=th))
        ref = _reference(img)
        assert out.shape == ref.shape, (out.shape, ref.shape)
        assert jnp.allclose(out, ref, atol=1e-3, rtol=1e-3), f"mismatch for shape {shape}"
    print("KERNEL_OK")
</pallas_src>

<mosaic_0001>
module attributes {stable_mosaic.version = 11 : i64} {
  func.func @_sobel_kernel(%arg0: i32, %arg1: i32, %arg2: memref<1x1x16x128xf32, #tpu.memory_space<vmem>>, %arg3: memref<1x1x8x128xf32, #tpu.memory_space<vmem>>, %arg4: memref<1x1x16x128xf32, #tpu.memory_space<vmem>>) attributes {dimension_semantics = [#tpu.dimension_semantics<parallel>, #tpu.dimension_semantics<parallel>], iteration_bounds = array<i64: 2, 1>, scalar_prefetch = 0 : i64, scratch_operands = 0 : i64, tpu.core_type = #tpu.core_type<tc>, window_params = [{transform_indices = @transform_0, window_bounds = array<i64: 1, 1, 16, 128>}, {transform_indices = @transform_1, window_bounds = array<i64: 1, 1, 8, 128>}, {transform_indices = @transform_2, window_bounds = array<i64: 1, 1, 16, 128>}]} {
    %c0 = arith.constant 0 : index
    %c0_0 = arith.constant 0 : index
    %c0_1 = arith.constant 0 : index
    %c0_2 = arith.constant 0 : index
    %0 = vector.load %arg2[%c0, %c0_0, %c0_1, %c0_2] : memref<1x1x16x128xf32, #tpu.memory_space<vmem>>, vector<1x1x14x128xf32>
    %1 = vector.shape_cast %0 : vector<1x1x14x128xf32> to vector<14x128xf32>
    %c0_3 = arith.constant 0 : index
    %c0_4 = arith.constant 0 : index
    %c1 = arith.constant 1 : index
    %c0_5 = arith.constant 0 : index
    %2 = vector.load %arg2[%c0_3, %c0_4, %c1, %c0_5] : memref<1x1x16x128xf32, #tpu.memory_space<vmem>>, vector<1x1x14x128xf32>
    %3 = vector.shape_cast %2 : vector<1x1x14x128xf32> to vector<14x128xf32>
    %c0_6 = arith.constant 0 : index
    %c0_7 = arith.constant 0 : index
    %c2 = arith.constant 2 : index
    %c0_8 = arith.constant 0 : index
    %4 = vector.load %arg2[%c0_6, %c0_7, %c2, %c0_8] : memref<1x1x16x128xf32, #tpu.memory_space<vmem>>, vector<1x1x14x128xf32>
    %5 = vector.shape_cast %4 : vector<1x1x14x128xf32> to vector<14x128xf32>
    %cst = arith.constant 2.000000e+00 : f32
    %6 = vector.broadcast %cst : f32 to vector<14x128xf32>
    %7 = arith.mulf %6, %3 : vector<14x128xf32>
    %8 = arith.addf %1, %7 : vector<14x128xf32>
    %9 = arith.addf %8, %5 : vector<14x128xf32>
    %10 = arith.subf %1, %5 : vector<14x128xf32>
    %c126_i32 = arith.constant 126 : i32
    %11 = tpu.dynamic_rotate %9 by %c126_i32 dim 1 : vector<14x128xf32>, i32 -> vector<14x128xf32>
    %c127_i32 = arith.constant 127 : i32
    %12 = tpu.dynamic_rotate %10 by %c127_i32 dim 1 : vector<14x128xf32>, i32 -> vector<14x128xf32>
    %c126_i32_9 = arith.constant 126 : i32
    %13 = tpu.dynamic_rotate %10 by %c126_i32_9 dim 1 : vector<14x128xf32>, i32 -> vector<14x128xf32>
    %14 = arith.subf %9, %11 : vector<14x128xf32>
    %cst_10 = arith.constant 2.000000e+00 : f32
    %15 = vector.broadcast %cst_10 : f32 to vector<14x128xf32>
    %16 = arith.mulf %15, %12 : vector<14x128xf32>
    %17 = arith.addf %10, %16 : vector<14x128xf32>
    %18 = arith.addf %17, %13 : vector<14x128xf32>
    %19 = arith.mulf %14, %14 : vector<14x128xf32>
    %20 = arith.mulf %18, %18 : vector<14x128xf32>
    %21 = arith.addf %19, %20 : vector<14x128xf32>
    %22 = math.sqrt %21 : vector<14x128xf32>
    %cst_11 = arith.constant 2.000000e+00 : f32
    %23 = vector.broadcast %cst_11 : f32 to vector<14x128xf32>
    %24 = arith.mulf %23, %22 : vector<14x128xf32>
    %c0_12 = arith.constant 0 : index
    %c0_13 = arith.constant 0 : index
    %c0_14 = arith.constant 0 : index
    %c0_15 = arith.constant 0 : index
    %25 = vector.load %arg4[%c0_12, %c0_13, %c0_14, %c0_15] : memref<1x1x16x128xf32, #tpu.memory_space<vmem>>, vector<1x1x14x128xf32>
    %26 = vector.shape_cast %25 : vector<1x1x14x128xf32> to vector<14x128xf32>
    %27 = vector.shape_cast %24 : vector<14x128xf32> to vector<1x1x14x128xf32>
    tpu.vector_store %arg4[%c0_12, %c0_13, %c0_14, %c0_15], %27 {strides = array<i32>} : memref<1x1x16x128xf32, #tpu.memory_space<vmem>>, vector<1x1x14x128xf32>,
    %c0_16 = arith.constant 0 : index
    %c0_17 = arith.constant 0 : index
    %c14 = arith.constant 14 : index
    %c0_18 = arith.constant 0 : index
    %28 = vector.load %arg2[%c0_16, %c0_17, %c14, %c0_18] : memref<1x1x16x128xf32, #tpu.memory_space<vmem>>, vector<1x1x1x128xf32>
    %29 = vector.shape_cast %28 : vector<1x1x1x128xf32> to vector<1x128xf32>
    %c0_19 = arith.constant 0 : index
    %c0_20 = arith.constant 0 : index
    %c15 = arith.constant 15 : index
    %c0_21 = arith.constant 0 : index
    %30 = vector.load %arg2[%c0_19, %c0_20, %c15, %c0_21] : memref<1x1x16x128xf32, #tpu.memory_space<vmem>>, vector<1x1x1x128xf32>
    %31 = vector.shape_cast %30 : vector<1x1x1x128xf32> to vector<1x128xf32>
    %c0_22 = arith.constant 0 : index
    %c0_23 = arith.constant 0 : index
    %c0_24 = arith.constant 0 : index
    %c0_25 = arith.constant 0 : index
    %32 = vector.load %arg3[%c0_22, %c0_23, %c0_24, %c0_25] : memref<1x1x8x128xf32, #tpu.memory_space<vmem>>, vector<1x1x1x128xf32>
    %33 = vector.shape_cast %32 : vector<1x1x1x128xf32> to vector<1x128xf32>
    %c0_26 = arith.constant 0 : index
    %c0_27 = arith.constant 0 : index
    %c1_28 = arith.constant 1 : index
    %c0_29 = arith.constant 0 : index
    %34 = vector.load %arg3[%c0_26, %c0_27, %c1_28, %c0_29] : memref<1x1x8x128xf32, #tpu.memory_space<vmem>>, vector<1x1x1x128xf32>
    %35 = vector.shape_cast %34 : vector<1x1x1x128xf32> to vector<1x128xf32>
    %cst_30 = arith.constant 2.000000e+00 : f32
    %36 = vector.broadcast %cst_30 : f32 to vector<1x128xf32>
    %37 = arith.mulf %36, %31 : vector<1x128xf32>
    %38 = arith.addf %29, %37 : vector<1x128xf32>
    %39 = arith.addf %38, %33 : vector<1x128xf32>
    %40 = arith.subf %29, %33 : vector<1x128xf32>
    %c126_i32_31 = arith.constant 126 : i32
    %41 = tpu.dynamic_rotate %39 by %c126_i32_31 dim 1 : vector<1x128xf32>, i32 -> vector<1x128xf32>
    %c127_i32_32 = arith.constant 127 : i32
    %42 = tpu.dynamic_rotate %40 by %c127_i32_32 dim 1 : vector<1x128xf32>, i32 -> vector<1x128xf32>
    %c126_i32_33 = arith.constant 126 : i32
    %43 = tpu.dynamic_rotate %40 by %c126_i32_33 dim 1 : vector<1x128xf32>, i32 -> vector<1x128xf32>
    %44 = arith.subf %39, %41 : vector<1x128xf32>
    %cst_34 = arith.constant 2.000000e+00 : f32
    %45 = vector.broadcast %cst_34 : f32 to vector<1x128xf32>
    %46 = arith.mulf %45, %42 : vector<1x128xf32>
    %47 = arith.addf %40, %46 : vector<1x128xf32>
    %48 = arith.addf %47, %43 : vector<1x128xf32>
    %49 = arith.mulf %44, %44 : vector<1x128xf32>
    %50 = arith.mulf %48, %48 : vector<1x128xf32>
    %51 = arith.addf %49, %50 : vector<1x128xf32>
    %52 = math.sqrt %51 : vector<1x128xf32>
    %cst_35 = arith.constant 2.000000e+00 : f32
    %53 = vector.broadcast %cst_35 : f32 to vector<1x128xf32>
    %54 = arith.mulf %53, %52 : vector<1x128xf32>
    %c0_36 = arith.constant 0 : index
    %c0_37 = arith.constant 0 : index
    %c14_38 = arith.constant 14 : index
    %c0_39 = arith.constant 0 : index
    %55 = vector.load %arg4[%c0_36, %c0_37, %c14_38, %c0_39] : memref<1x1x16x128xf32, #tpu.memory_space<vmem>>, vector<1x1x1x128xf32>
    %56 = vector.shape_cast %55 : vector<1x1x1x128xf32> to vector<1x128xf32>
    %57 = vector.shape_cast %54 : vector<1x128xf32> to vector<1x1x1x128xf32>
    tpu.vector_store %arg4[%c0_36, %c0_37, %c14_38, %c0_39], %57 {strides = array<i32>} : memref<1x1x16x128xf32, #tpu.memory_space<vmem>>, vector<1x1x1x128xf32>,
    %cst_40 = arith.constant 2.000000e+00 : f32
    %58 = vector.broadcast %cst_40 : f32 to vector<1x128xf32>
    %59 = arith.mulf %58, %33 : vector<1x128xf32>
    %60 = arith.addf %31, %59 : vector<1x128xf32>
    %61 = arith.addf %60, %35 : vector<1x128xf32>
    %62 = arith.subf %31, %35 : vector<1x128xf32>
    %c126_i32_41 = arith.constant 126 : i32
    %63 = tpu.dynamic_rotate %61 by %c126_i32_41 dim 1 : vector<1x128xf32>, i32 -> vector<1x128xf32>
    %c127_i32_42 = arith.constant 127 : i32
    %64 = tpu.dynamic_rotate %62 by %c127_i32_42 dim 1 : vector<1x128xf32>, i32 -> vector<1x128xf32>
    %c126_i32_43 = arith.constant 126 : i32
    %65 = tpu.dynamic_rotate %62 by %c126_i32_43 dim 1 : vector<1x128xf32>, i32 -> vector<1x128xf32>
    %66 = arith.subf %61, %63 : vector<1x128xf32>
    %cst_44 = arith.constant 2.000000e+00 : f32
    %67 = vector.broadcast %cst_44 : f32 to vector<1x128xf32>
    %68 = arith.mulf %67, %64 : vector<1x128xf32>
    %69 = arith.addf %62, %68 : vector<1x128xf32>
    %70 = arith.addf %69, %65 : vector<1x128xf32>
    %71 = arith.mulf %66, %66 : vector<1x128xf32>
    %72 = arith.mulf %70, %70 : vector<1x128xf32>
    %73 = arith.addf %71, %72 : vector<1x128xf32>
    %74 = math.sqrt %73 : vector<1x128xf32>
    %cst_45 = arith.constant 2.000000e+00 : f32
    %75 = vector.broadcast %cst_45 : f32 to vector<1x128xf32>
    %76 = arith.mulf %75, %74 : vector<1x128xf32>
    %c0_46 = arith.constant 0 : index
    %c0_47 = arith.constant 0 : index
    %c15_48 = arith.constant 15 : index
    %c0_49 = arith.constant 0 : index
    %77 = vector.load %arg4[%c0_46, %c0_47, %c15_48, %c0_49] : memref<1x1x16x128xf32, #tpu.memory_space<vmem>>, vector<1x1x1x128xf32>
    %78 = vector.shape_cast %77 : vector<1x1x1x128xf32> to vector<1x128xf32>
    %79 = vector.shape_cast %76 : vector<1x128xf32> to vector<1x1x1x128xf32>
    tpu.vector_store %arg4[%c0_46, %c0_47, %c15_48, %c0_49], %79 {strides = array<i32>} : memref<1x1x16x128xf32, #tpu.memory_space<vmem>>, vector<1x1x1x128xf32>,
    return
  }
  func.func @transform_0(%arg0: i32, %arg1: i32) -> (i32, i32, i32, i32) {
    %c0_i32 = arith.constant 0 : i32
    %c0_i32_0 = arith.constant 0 : i32
    %c0_i32_1 = arith.constant 0 : i32
    return %arg0, %c0_i32, %arg1, %c0_i32_0 : i32, i32, i32, i32
  }
  func.func @transform_1(%arg0: i32, %arg1: i32) -> (i32, i32, i32, i32) {
    %c1_i32 = arith.constant 1 : i32
    %0 = arith.addi %arg1, %c1_i32 : i32
    %c2_i32 = arith.constant 2 : i32
    %1 = arith.muli %0, %c2_i32 : i32
    %c1_i32_0 = arith.constant 1 : i32
    %2 = arith.minsi %1, %c1_i32_0 : i32
    %c0_i32 = arith.constant 0 : i32
    %c0_i32_1 = arith.constant 0 : i32
    %c0_i32_2 = arith.constant 0 : i32
    return %arg0, %c0_i32, %2, %c0_i32_1 : i32, i32, i32, i32
  }
  func.func @transform_2(%arg0: i32, %arg1: i32) -> (i32, i32, i32, i32) {
    %c0_i32 = arith.constant 0 : i32
    %c0_i32_0 = arith.constant 0 : i32
    %c0_i32_1 = arith.constant 0 : i32
    return %arg0, %c0_i32, %arg1, %c0_i32_0 : i32, i32, i32, i32
  }
}

</mosaic_0001>

<bundles_post_ra>
// kernel: tpu_custom_call.1
= control target key start
LH: loop header
LB: loop body
LE: loop exit
PB: predicated region body
PF: predicated region fallthrough
CT: control target
= control target key end

     0   :  { %7 = vsyncpa [#allocation3], 0  ;;  %s881_s0 = inlined_call_operand.hbm [shape: f32[2,1,16,16], index: 0, kind: input, shape index: {}]   ;;  %s882_s1 = inlined_call_operand.hbm [shape: f32[2,1,16,16], index: 1, kind: input, shape index: {}]   ;;  %s883_s2 = inlined_call_operand.vmem [shape: f32[2,1,14,14], index: 2, kind: output, shape index: {}]  }
   0x1   :  { %9 = vsyncpa [#allocation3 + $0x1], 0 }
   0x2   :  { %10 = vsyncpa [#allocation5], 0 }
   0x3   :  { %12 = vsyncpa [#allocation5 + $0x1], 0  ;;  %s714_s9 = smov 0   ;;  %s716_s10 = smov 0  }
   0x4   :  { %s718_s11 = smov 0   ;;  %s720_s12 = smov 0  }
   0x5   :  { %s722_s13 = smov 0   ;;  %s724_s14 = smov 0  }
   0x6 LB: > { %s483_s15 = sadd.s32 4294967295, %s691_s14   ;;  %s30_s16 = sadd.s32 1, %s687_s13  ;;  %s691_s14 = sphi %s724_s14, %s18_s14   ;;  %s687_s13 = sphi %s722_s13, %s895_s13   ;;  %s683_s12 = sphi %s720_s12, %s894_s12   ;;  %s679_s11 = sphi %s718_s11, %s893_s11   ;;  %s675_s10 = sphi %s716_s10, %s892_s10   ;;  %s671_s9 = sphi %s714_s9, %s891_s9  }
   0x7   : > { %p32_p0 = scmp.ge.s32.totalorder %s30_s16, 2  ;;  %s39_s17 = sadd.s32 1, %s679_s11 }
   0x8   : > { %p46_p1 = scmp.ne.s32.totalorder %s679_s11, %s675_s10  ;;  %p47_p2 = scmp.eq.s32.totalorder %s691_s14, 0 }
   0x9   : > { %s897_s16 = smov (%p32_p0, %s30_s16), 0  ;;  %p52_p4 = scmp.ne.s32.totalorder %s675_s10, %s671_s9 }
   0xa   : > { %p750_p3 = por %p47_p2, %p46_p1  ;;  %s34_s19 = ssub.s32 %s687_s13, %s897_s16 }
   0xb   : > { %p53_p5 = scmp.eq.s32.totalorder %s483_s15, 0  ;;  %p37_p6 = scmp.eq.s32.totalorder %s34_s19, 0 }
   0xc   : > { %p516_p8 = scmp.lt.s32.totalorder %s691_s14, 2  ;;  %s766_s22 = sand.u32 1, %s679_s11  }
   0xd   : > { %p757_p7 = por %p53_p5, %p52_p4  ;;  %s500_s23 = sshll.u32 %s687_s13, 8 }
   0xe   : > { %s763_s21 = scalar_select %p37_p6, %s679_s11, %s39_s17  }
   0xf   : > { %s886_s20 = scalar_select %p757_p7, 1, 0 }
  0x10   : > { %s487_s24 = sshll.u32 %s766_s22, 4  ;;  %s775_s27 = scalar_lea.hbm %s881_s0, %s500_s23 }
  0x11   : > { %s144_s28 = scalar_lea.vmem [#allocation2], %s487_s24  ;;  %p779_p9 = pnand %p516_p8, %p750_p3 }
  0x12   : > { %s153_s29 = sshll.u32 %s144_s28, 4  ;;  %s141_s3 = scalar_lea.sflag [#allocation3], %s766_s22  ;;  %s783_s29 = int_to_ptr.vmem [resolvable:$true] %s153_s29 }
  0x13   : > { %s577_s4 = scalar_lea.hbm %s775_s27, 256  ;;  %p579_p11 = pneg %p779_p9 }
  0x14   : > { %p578_p10 = scmp.ne.s32.totalorder %s775_s27, %s577_s4  ;;  %s582_s7 = scalar_lea.hbm %s881_s0, 512 }
  0x15   : > { %p583_p0 = scmp.lt.u32.totalorder %s775_s27, %s881_s0  ;;  %p584_p1 = scmp.lt.u32.totalorder %s582_s7, %s577_s4 }
  0x16   : > { %p580_p12 = pnand %p579_p11, %p578_p10  ;;  %p586_p3 = scmp.lt.u32.totalorder %s577_s4, %s775_s27 }
  0x17   : > { %p585_p2 = por %p584_p1, %p583_p0 }
  0x18   : > { %p581_p13 = pneg %p580_p12 }
  0x19   : > { %p587_p4 = por %p586_p3, %p585_p2 }
  0x1b   : > { %p588_p5 = pnand %p587_p4, %p581_p13 }
  0x1d   : > { %591 = shalt.err (!%p588_p5)
}
  0x1e   : > { %s592_s15 = scalar_lea.vmem %s783_s29, 256  ;;  %s693_s17 = smov [#allocation2]  }
  0x1f   : > { %p593_p6 = scmp.ne.s32.totalorder %s783_s29, %s592_s15  ;;  %s597_s18 = sshll.u32 %s693_s17, 4  ;;  %s598_s18 = int_to_ptr.vmem [resolvable:$false] %s597_s18 }
  0x20   : > { %s599_s19 = scalar_lea.vmem %s598_s18, 512  ;;  %p600_p12 = scmp.lt.s32.totalorder %s783_s29, %s598_s18 }
  0x21   : > { %p595_p8 = pnand %p593_p6, %p579_p11  ;;  %p601_p0 = scmp.lt.s32.totalorder %s599_s19, %s592_s15 }
  0x23   : > { %p596_p10 = pneg %p595_p8  ;;  %p602_p1 = por %p601_p0, %p600_p12 }
  0x25   : > { %p603_p2 = pnand %p602_p1, %p596_p10 }
  0x27   : > { %606 = shalt.err (!%p603_p2)
}
  0x28   : > { %s694_s24 = smov 128   ;;  %s695_s25 = smov 8  }
  0x29   : > { %512 = dma.hbm_to_vmem [thread:$0]  (!%p779_p9), %s775_s27, 256, %s783_s29, %s141_s3, %s694_s24, %s694_s24, %s695_s25  }
  0x2a   : > { %p493_p13 = scmp.ge.s32.totalorder %s691_s14, 1  ;;  %p185_p3 = scmp.lt.s32.totalorder %s691_s14, 3 }
  0x2b   : > { %s490_s26 = sshll.u32 %s766_s22, 3  ;;  %s502_s4 = sadd.s32 128, %s500_s23 }
  0x2c   : > { %p816_p4 = pnand %p493_p13, %p185_p3  ;;  %s167_s5 = scalar_lea.vmem [#allocation4], %s490_s26 }
  0x2d   : > { %s180_s6 = sshll.u32 %s167_s5, 4  ;;  %s825_s9 = scalar_lea.hbm %s882_s1, %s502_s4  ;;  %s181_s6 = int_to_ptr.vmem [resolvable:$true] %s180_s6 }
  0x2e   : > { %s888_s28 = scalar_select %p816_p4, 1, 0 }
  0x2f   : > { %s164_s27 = scalar_lea.sflag [#allocation5], %s766_s22  ;;  %s607_s29 = scalar_lea.hbm %s825_s9, 128 }
  0x30   : > { %p608_p5 = scmp.ne.s32.totalorder %s825_s9, %s607_s29  ;;  %s612_s15 = scalar_lea.hbm %s882_s1, 512 }
  0x31   : > { %p613_p10 = scmp.lt.u32.totalorder %s825_s9, %s882_s1  ;;  %p614_p12 = scmp.lt.u32.totalorder %s612_s15, %s607_s29 }
  0x32   : > { %p610_p6 = pnand %p608_p5, %p579_p11  ;;  %p616_p1 = scmp.lt.u32.totalorder %s607_s29, %s825_s9 }
  0x33   : > { %p615_p0 = por %p614_p12, %p613_p10 }
  0x34   : > { %p611_p8 = pneg %p610_p6 }
  0x35   : > { %p617_p2 = por %p616_p1, %p615_p0 }
  0x37   : > { %p618_p13 = pnand %p617_p2, %p611_p8 }
  0x39   : > { %621 = shalt.err (!%p618_p13)
}
  0x3a   : > { %s622_s22 = scalar_lea.vmem %s181_s6, 128  ;;  %s696_s19 = smov [#allocation4]  }
  0x3b   : > { %p623_p3 = scmp.ne.s32.totalorder %s181_s6, %s622_s22  ;;  %s627_s24 = sshll.u32 %s696_s19, 4  ;;  %s628_s24 = int_to_ptr.vmem [resolvable:$false] %s627_s24 }
  0x3c   : > { %s629_s25 = scalar_lea.vmem %s628_s24, 256  ;;  %p630_p7 = scmp.lt.s32.totalorder %s181_s6, %s628_s24 }
  0x3d   : > { %p625_p5 = pnand %p623_p3, %p579_p11  ;;  %p631_p4 = scmp.lt.s32.totalorder %s629_s25, %s622_s22 }
  0x3f   : > { %p626_p6 = pneg %p625_p5  ;;  %p632_p10 = por %p631_p4, %p630_p7 }
  0x41   : > { %p633_p12 = pnand %p632_p10, %p626_p6 }
  0x43   : > { %636 = shalt.err (!%p633_p12)
}
  0x44   : > { %515 = dma.hbm_to_vmem [thread:$0]  (!%p779_p9), %s825_s9, 128, %s181_s6, %s164_s27  }
  0x45   : > { %p889_p8 = scmp.ne.s32.totalorder %s888_s28, 0 }
  0x46   : > { %s191_s26 = sand.u32 (!%p889_p8), 1, %s675_s10   ;;  %p890_p11 = scmp.ne.s32.totalorder (!%p889_p8), %s886_s20, 0 }
  0x47   : > { %189 = sbr.rel (%p889_p8) target bundleno = 246 (0xf6), region = 28  ;;  %s494_s4 = sshll.u32 (!%p889_p8), %s191_s26, 4 }
  0x48   : > { %s192_s5 = scalar_lea.sflag (!%p889_p8), [#allocation3], %s191_s26  ;;  %s195_s7 = scalar_lea.vmem (!%p889_p8), [#allocation2], %s494_s4 }
  0x4e   : > { %662 = dma.done.wait (%p890_p11), %s192_s5, 256  }
  0x4f   : > { %664 = vsyncadd (%p890_p11), %s192_s5, 4294967040  ;;  %s495_s8 = sshll.u32 %s191_s26, 3  ;;  %s201_s29 = scalar_lea.sflag [#allocation5], %s191_s26 }
  0x50   : > { %s204_s30 = scalar_lea.vmem [#allocation4], %s495_s8 }
  0x51   : > { %666 = dma.done.wait (%p890_p11), %s201_s29, 128  }
  0x52   : > { %668 = vsyncadd (%p890_p11), %s201_s29, 4294967168  ;;  %v307_v0 = vld [vmem:[%s195_s7 + $0xe] sm:$0x1]  ;;  %v309_v1 = vld [vmem:[%s204_s30] sm:$0x1]  ;;  %s697_s28 = smov 127  }
  0x53   : > { %v249_v2 = vld [vmem:[%s195_s7] sm:$0xff]  ;;  %v314_v3 = vsub.f32 %v307_v0, %v309_v1  ;;  %v308_v5 = vld [vmem:[%s195_s7 + $0xf] sm:$0x1]  ;;  %v250_v8 = vld [vmem:[%s195_s7 + $0x8] sm:$0x3f]  ;;  %s698_s20 = smov 126  }
  0x54   : > { %v253_v4 = vld [vmem:[%s195_s7 + $0x2] sm:$0xff]  ;;  %v310_v6 = vld [vmem:[%s204_s30 + $0x1] sm:$0x1]  ;;  %v254_v9 = vld [vmem:[%s195_s7 + $0xa] sm:$0x3f]  ;;  %v311_v18 = vmul.f32 2.0, %v308_v5 }
  0x55   : > { %v261_v7 = vsub.f32 %v249_v2, %v253_v4  ;;  %v252_v10 = vld [vmem:[%s195_s7 + $0x9] sm:$0x3f]  ;;  %317 = vrot.lane.b32.xlu1 %v314_v3, %s697_s28  ;;  %v340_v11 = vsub.f32 %v308_v5, %v310_v6  ;;  %v251_v13 = vld [vmem:[%s195_s7 + $0x1] sm:$0xff]  ;;  %v262_v14 = vsub.f32 %v250_v8, %v254_v9  ;;  %v337_v22 = vmul.f32 2.0, %v309_v1  ;;  %p240_p7 = scmp.lt.s32.totalorder %s683_s12, 1 }
  0x56   : > { %v256_v12 = vmul.f32 2.0, %v252_v10  ;;  %v255_v15 = vmul.f32 2.0, %v251_v13  ;;  %v312_v21 = vadd.f32 %v311_v18, %v307_v0 }
  0x57   : > { %267 = vrot.lane.b32.xlu0 %v261_v7, %s697_s28  ;;  %v338_v24 = vadd.f32 %v337_v22, %v308_v5  ;;  %s899_s12 = smov (!%p240_p7, %s683_s12), 1 }
  0x58   : > { %v258_v16 = vadd.f32 %v256_v12, %v250_v8  ;;  %v257_v17 = vadd.f32 %v255_v15, %v249_v2  ;;  %v313_v23 = vadd.f32 %v312_v21, %v309_v1  ;;  %s503_s6 = sshll.u32 %s899_s12, 4 }
  0x59   : > { %343 = vrot.lane.b32.xlu1 %v340_v11, %s697_s28  ;;  %v339_v25 = vadd.f32 %v338_v24, %v310_v6  ;;  %s247_s23 = scalar_lea.vmem %s883_s2, %s503_s6 }
  0x5a   : > { %v260_v19 = vadd.f32 %v258_v16, %v254_v9  ;;  %v259_v20 = vadd.f32 %v257_v17, %v253_v4 }
  0x5b   : > { %269 = vrot.lane.b32.xlu0 %v262_v14, %s697_s28 }
  0x5d   : > { %273 = vrot.lane.b32.xlu1 %v262_v14, %s698_s20 }
  0x5f   : > { %271 = vrot.lane.b32.xlu0 %v261_v7, %s698_s20 }
  0x61   : > { %265 = vrot.lane.b32.xlu1 %v260_v19, %s698_s20 }
  0x63   : > { %263 = vrot.lane.b32.xlu0 %v259_v20, %s698_s20 }
  0x65   : > { %319 = vrot.lane.b32.xlu1 %v314_v3, %s698_s20 }
  0x67   : > { %315 = vrot.lane.b32.xlu0 %v313_v23, %s698_s20 }
  0x69   : > { %345 = vrot.lane.b32.xlu1 %v340_v11, %s698_s20 }
  0x6b   : > { %341 = vrot.lane.b32.xlu0 %v339_v25, %s698_s20 }
  0xc7   : > { %v318_v26 = vpop.permute.xlu1 %317 }
  0xc8   : > { %v322_v36 = vmul.f32 2.0, %v318_v26 }
  0xc9   : > { %v268_v27 = vpop.permute.xlu0 %267 }
  0xca   : > { %v277_v30 = vmul.f32 2.0, %v268_v27  ;;  %v323_v46 = vadd.f32 %v322_v36, %v314_v3 }
  0xcb   : > { %v344_v28 = vpop.permute.xlu1 %343 }
  0xcc   : > { %v279_v35 = vadd.f32 %v277_v30, %v261_v7  ;;  %v348_v43 = vmul.f32 2.0, %v344_v28 }
  0xcd   : > { %v270_v29 = vpop.permute.xlu0 %269 }
  0xce   : > { %v278_v31 = vmul.f32 2.0, %v270_v29  ;;  %v349_v55 = vadd.f32 %v348_v43, %v340_v11 }
  0xcf   : > { %v274_v32 = vpop.permute.xlu1 %273 }
  0xd0   : > { %v280_v33 = vadd.f32 %v278_v31, %v262_v14 }
  0xd1   : > { %v272_v34 = vpop.permute.xlu0 %271 }
  0xd2   : > { %v282_v37 = vadd.f32 %v280_v33, %v274_v32  ;;  %v281_v38 = vadd.f32 %v279_v35, %v272_v34 }
  0xd3   : > { %v266_v39 = vpop.permute.xlu1 %265 }
  0xd4   : > { %v276_v40 = vsub.f32 %v260_v19, %v266_v39  ;;  %v286_v44 = vmul.f32 %v282_v37, %v282_v37  ;;  %v285_v47 = vmul.f32 %v281_v38, %v281_v38 }
  0xd5   : > { %v264_v41 = vpop.permute.xlu0 %263 }
  0xd6   : > { %v275_v42 = vsub.f32 %v259_v20, %v264_v41  ;;  %v284_v45 = vmul.f32 %v276_v40, %v276_v40 }
  0xd7   : > { %v320_v49 = vpop.permute.xlu1 %319 }
  0xd8   : > { %v283_v48 = vmul.f32 %v275_v42, %v275_v42  ;;  %v288_v50 = vadd.f32 %v286_v44, %v284_v45  ;;  %v324_v51 = vadd.f32 %v323_v46, %v320_v49 }
  0xd9   : > { %v316_v52 = vpop.permute.xlu0 %315 }
  0xda   : > { %v287_v53 = vadd.f32 %v285_v47, %v283_v48  ;;  %v321_v54 = vsub.f32 %v313_v23, %v316_v52  ;;  %569 = vrsqrt.f32 %v288_v50  ;;  %v326_v57 = vmul.f32 %v324_v51, %v324_v51 }
  0xdb   : > { %v346_v56 = vpop.permute.xlu1 %345  ;;  %vm298_vm0 = vcmp.eq.f32.partialorder %v288_v50, inf  ;;  %v301_v5 = vand.u32 2147483648, %v288_v50  ;;  %vm300_vm1 = vcmp.eq.f32.partialorder %v288_v50, 0.0 }
  0xdc   : > { %571 = vrsqrt.f32 %v287_v53  ;;  %v325_v58 = vmul.f32 %v321_v54, %v321_v54  ;;  %v350_v59 = vadd.f32 %v349_v55, %v346_v56  ;;  %vm291_vm2 = vcmp.eq.f32.partialorder %v287_v53, inf }
  0xdd   : > { %v342_v60 = vpop.permute.xlu0 %341  ;;  %v294_v8 = vand.u32 2147483648, %v287_v53  ;;  %vm293_vm3 = vcmp.eq.f32.partialorder %v287_v53, 0.0 }
  0xde   : > { %v347_v61 = vsub.f32 %v339_v25, %v342_v60  ;;  %v327_v62 = vadd.f32 %v326_v57, %v325_v58  ;;  %v352_v63 = vmul.f32 %v350_v59, %v350_v59 }
  0xe0   : > { %v351_v0 = vmul.f32 %v347_v61, %v347_v61  ;;  %573 = vrsqrt.f32 %v327_v62  ;;  %vm330_vm4 = vcmp.eq.f32.partialorder %v327_v62, inf  ;;  %v333_v16 = vand.u32 2147483648, %v327_v62 }
  0xe1   : > { %vm332_vm5 = vcmp.eq.f32.partialorder %v327_v62, 0.0 }
  0xe2   : > { %v353_v1 = vadd.f32 %v352_v63, %v351_v0 }
  0xe4   : > { %575 = vrsqrt.f32 %v353_v1  ;;  %v570_v2 = vpop.eup %569  ;;  %vm356_vm6 = vcmp.eq.f32.partialorder %v353_v1, inf  ;;  %v359_v22 = vand.u32 2147483648, %v353_v1  ;;  %vm358_vm7 = vcmp.eq.f32.partialorder %v353_v1, 0.0 }
  0xe5   : > { %v297_v4 = vmul.f32 %v570_v2, %v288_v50 }
  0xe6   : > { %v572_v3 = vpop.eup %571 }
  0xe7   : > { %v290_v6 = vmul.f32 %v572_v3, %v287_v53  ;;  %v299_v7 = vsel %vm298_vm0, %v288_v50, %v297_v4 }
  0xe8   : > { %v302_v9 = vsel %vm300_vm1, %v301_v5, %v299_v7 }
  0xe9   : > { %v292_v10 = vsel %vm291_vm2, %v287_v53, %v290_v6  ;;  %v304_v11 = vmul.f32 2.0, %v302_v9 }
  0xea   : > { %v295_v12 = vsel %vm293_vm3, %v294_v8, %v292_v10  ;;  %v574_v13 = vpop.eup %573 }
  0xeb   : > { %v303_v14 = vmul.f32 2.0, %v295_v12  ;;  %306 = vst [vmem:[%s247_s23 + $0x8] sm:$0x3f] %v304_v11  ;;  %v329_v15 = vmul.f32 %v574_v13, %v327_v62 }
  0xed   : > { %305 = vst [vmem:[%s247_s23] sm:$0xff] %v303_v14  ;;  %v331_v18 = vsel %vm330_vm4, %v327_v62, %v329_v15 }
  0xee   : > { %v576_v17 = vpop.eup %575  ;;  %v334_v19 = vsel %vm332_vm5, %v333_v16, %v331_v18 }
  0xef   : > { %v355_v20 = vmul.f32 %v576_v17, %v353_v1  ;;  %v335_v21 = vmul.f32 2.0, %v334_v19 }
  0xf1   : > { %v357_v23 = vsel %vm356_vm6, %v353_v1, %v355_v20  ;;  %336 = vst [vmem:[%s247_s23 + $0xe] sm:$0x1] %v335_v21 }
  0xf2   : > { %v360_v24 = vsel %vm358_vm7, %v359_v22, %v357_v23 }
  0xf3   : > { %v361_v25 = vmul.f32 2.0, %v360_v24 }
  0xf5   : > { %362 = vst [vmem:[%s247_s23 + $0xf] sm:$0x1] %v361_v25 }
  0xf6 PF: > { %s18_s14 = sadd.s32 1, %s691_s14   ;;  %s891_s9 = smov %s675_s10 }
  0xf7   : > { %p15_p9 = scmp.ge.s32.totalorder %s18_s14, 4   ;;  %s892_s10 = smov %s679_s11 }
  0xf8   : > { %s893_s11 = smov %s763_s21  ;;  %s894_s12 = smov %s687_s13 }
  0xf9   : > { %s895_s13 = smov %s897_s16  ;;  %17 = sbr.rel (!%p15_p9) target bundleno = 6 (0x6), region = 81 }
 0x100   :  { %393 = vsyncpa [#allocation3], 1 }
 0x101   :  { %395 = vsyncpa [#allocation3 + $0x1], 1 }
 0x102   :  { %396 = vsyncpa [#allocation5], 1 }
 0x103   :  { %398 = vsyncpa [#allocation5 + $0x1], 1 }

</bundles_post_ra>
